<compile_context>
chip_gen: v5e
topology: v5e:2x2
jax: 0.10.0
libtpu: 0.0.40
codegen_flags: <defaults>
</compile_context>

<pallas_src>
import functools
import math

import jax
import jax.numpy as jnp
from jax import lax
from jax.experimental import pallas as pl
from jax.experimental.pallas import tpu as pltpu

LANES = 128
MAX_BLOCK_ROWS = 1024   # (1024, 128) f32 block = 512 KiB
NUM_SLICES = 2          # leading "parallel" grid axis (both TCs on v7x)


def _elementwise_nll(mu_ref, sigma_ref, labels_ref, *, dist):
    """Stable elementwise -log(likelihood) in f32 (VPU + EUP work only)."""
    mu = mu_ref[...].astype(jnp.float32)
    sigma = sigma_ref[...].astype(jnp.float32)
    lbl = labels_ref[...].astype(jnp.float32)

    z = (mu - lbl) / sigma
    if dist == 'gaussian':
        # -log(exp(-0.5*d^2/s^2)/s) = 0.5*(d/s)^2 + log(s)
        return 0.5 * z * z + jnp.log(sigma)
    # -log(0.5*exp(-|d|/b)/b) = |d|/b + log(b) + log(2)
    return jnp.abs(z) + jnp.log(sigma) + jnp.float32(math.log(2.0))


def _nll_sum_kernel(mu_ref, sigma_ref, labels_ref, out_ref, acc_ref, *,
                    dist, n, block_rows, tiles_per_slice, exact):
    """Accumulate (masked) NLL partial sums; write one scalar per slice."""
    s = pl.program_id(0)   # parallel slice index
    t = pl.program_id(1)   # sequential reduction index within the slice

    @pl.when(t == 0)
    def _():
        acc_ref[...] = jnp.zeros_like(acc_ref)

    nll = _elementwise_nll(mu_ref, sigma_ref, labels_ref, dist=dist)

    if exact:
        # Everything tiles evenly: no padding, no clamped overflow blocks.
        acc_ref[...] += nll
    else:
        # In-kernel tail masking: only flat elements < n contribute. Handles
        # any padding value and out-of-range (clamped) overflow blocks.
        block_idx = s * tiles_per_slice + t
        row_start = block_idx * block_rows
        row_ids = row_start + lax.broadcasted_iota(jnp.int32, nll.shape, 0)
        lane_ids = lax.broadcasted_iota(jnp.int32, nll.shape, 1)
        full_rows = n // LANES
        rem = n % LANES
        mask = (row_ids < full_rows) | ((row_ids == full_rows) & (lane_ids < rem))
        acc_ref[...] += jnp.where(mask, nll, 0.0)

    @pl.when(t == pl.num_programs(1) - 1)
    def _():
        out_ref[0, 0] = jnp.sum(acc_ref[...])


def _nll_map_kernel(mu_ref, sigma_ref, labels_ref, out_ref, *, dist):
    """Elementwise NLL map for reduction='none'."""
    out_ref[...] = _elementwise_nll(mu_ref, sigma_ref, labels_ref, dist=dist)


def _to_slab(x, pad_value, rows, padded, n):
    # Keep original dtype (no wrapper upcast). Pure metadata reshape (no copy)
    # when n is lane-aligned; otherwise pad only up to the next 128.
    flat = jnp.ravel(x)
    if padded != n:
        flat = jnp.pad(flat, (0, padded - n), constant_values=pad_value)
    return flat.reshape(rows, LANES)


def parametric_depth_nll_loss(mus, sigmas, labels, *, dist='gaussian',
                              reduction='mean', loss_weight=1.0):
    """JAX/Pallas equivalent of Parametric_Depth_NLL_Loss.forward."""
    assert mus.shape == sigmas.shape == labels.shape
    assert dist in ('gaussian', 'laplacian')
    assert reduction in ('mean', 'sum', 'none')

    n = mus.size
    rows = -(-n // LANES)          # ceil
    padded = rows * LANES

    mu2 = _to_slab(mus, 0.0, rows, padded, n)
    sg2 = _to_slab(sigmas, 1.0, rows, padded, n)   # 1.0 keeps log finite in pad
    lb2 = _to_slab(labels, 0.0, rows, padded, n)

    block_rows = rows if rows <= MAX_BLOCK_ROWS else MAX_BLOCK_ROWS

    if reduction == 'none':
        # Elementwise streaming kernel: independent row-blocks, lane-dense out.
        num_blocks = -(-rows // block_rows)
        tile_spec = pl.BlockSpec((block_rows, LANES), lambda i: (i, 0))
        nll_slab = pl.pallas_call(
            functools.partial(_nll_map_kernel, dist=dist),
            out_shape=jax.ShapeDtypeStruct((rows, LANES), jnp.float32),
            grid_spec=pltpu.PrefetchScalarGridSpec(
                num_scalar_prefetch=0,
                grid=(num_blocks,),
                in_specs=[tile_spec, tile_spec, tile_spec],
                out_specs=tile_spec,
            ),
            compiler_params=pltpu.CompilerParams(
                dimension_semantics=("parallel",)),
        )(mu2, sg2, lb2)
        nll = nll_slab.reshape(-1)[:n].reshape(mus.shape)
        return jnp.float32(loss_weight) * nll

    total_tiles = -(-rows // block_rows)
    num_slices = min(NUM_SLICES, total_tiles)
    tiles_per_slice = -(-total_tiles // num_slices)
    # Can we statically drop the tail mask? (dense, evenly tiled, even split)
    exact = (n == padded and rows == total_tiles * block_rows
             and total_tiles == num_slices * tiles_per_slice)

    def in_map(s, t):
        # Clamp overflow (s, t) combinations to the last real block; their
        # contribution is masked to zero inside the kernel (non-exact case).
        return (jnp.minimum(s * tiles_per_slice + t, total_tiles - 1), 0)

    tile_spec = pl.BlockSpec((block_rows, LANES), in_map)
    out_spec = pl.BlockSpec((1, 1), lambda s, t: (s, 0),
                            memory_space=pltpu.SMEM)

    kernel = functools.partial(
        _nll_sum_kernel, dist=dist, n=n, block_rows=block_rows,
        tiles_per_slice=tiles_per_slice, exact=exact)

    partials = pl.pallas_call(
        kernel,
        out_shape=jax.ShapeDtypeStruct((num_slices, 1), jnp.float32),
        grid_spec=pltpu.PrefetchScalarGridSpec(
            num_scalar_prefetch=0,
            grid=(num_slices, tiles_per_slice),
            in_specs=[tile_spec, tile_spec, tile_spec],
            out_specs=out_spec,
            scratch_shapes=[pltpu.VMEM((block_rows, LANES), jnp.float32)],
        ),
        compiler_params=pltpu.CompilerParams(
            dimension_semantics=("parallel", "arbitrary")),
    )(mu2, sg2, lb2)

    total = jnp.sum(partials)
    if reduction == 'mean':
        total = total / jnp.float32(n)
    return jnp.float32(loss_weight) * total


def _reference(mus, sigmas, labels, dist='gaussian', reduction='mean',
               loss_weight=1.0):
    """Literal transcription of the PyTorch module (exp -> -log -> reduce)."""
    mu = mus.astype(jnp.float32)
    s = sigmas.astype(jnp.float32)
    l = labels.astype(jnp.float32)
    if dist == 'gaussian':
        lik = jnp.exp(-0.5 * (mu - l) ** 2 / s ** 2) / s
    else:
        lik = 0.5 * jnp.exp(-jnp.abs(mu - l) / s) / s
    nll = -jnp.log(lik)
    if reduction == 'mean':
        nll = jnp.mean(nll)
    elif reduction == 'sum':
        nll = jnp.sum(nll)
    return loss_weight * nll


if __name__ == "__main__":
    key = jax.random.PRNGKey(0)
    k1, k2, k3 = jax.random.split(key, 3)

    # Depth-prediction-like NCHW inputs: batch=2, channels=4, 16x16 spatial.
    # Keep sigma away from 0 and residuals small so the *literal* reference
    # (exp then -log) stays finite in f32; the kernel uses the equivalent
    # stable form, so both agree.
    shape = (2, 4, 16, 16)
    mus = jax.random.normal(k1, shape, dtype=jnp.float32) * 2.0 + 10.0
    sigmas = jax.nn.softplus(jax.random.normal(k2, shape, dtype=jnp.float32)) + 0.5
    labels = mus + 0.3 * jax.random.normal(k3, shape, dtype=jnp.float32)

    for dist in ('gaussian', 'laplacian'):
        for red in ('mean', 'sum'):
            loss = jax.block_until_ready(
                parametric_depth_nll_loss(mus, sigmas, labels, dist=dist,
                                          reduction=red, loss_weight=1.0))
            ref = _reference(mus, sigmas, labels, dist=dist, reduction=red)
            assert jnp.allclose(loss, ref, rtol=1e-5, atol=1e-5), (
                dist, red, loss, ref)
        # reduction='none' elementwise map
        nll_map = jax.block_until_ready(
            parametric_depth_nll_loss(mus, sigmas, labels, dist=dist,
                                      reduction='none', loss_weight=1.0))
        ref_map = _reference(mus, sigmas, labels, dist=dist, reduction='none')
        assert nll_map.shape == shape
        assert jnp.allclose(nll_map, ref_map, rtol=1e-5, atol=1e-5), dist

    # Non-128-multiple size exercises the in-kernel ragged-tail masking
    # (and the ragged slice/reshape of the 'none' path).
    rshape = (2, 3, 15, 17)   # 1530 elements
    rm = jax.random.normal(k1, rshape, dtype=jnp.float32) + 5.0
    rs = jax.nn.softplus(jax.random.normal(k2, rshape, dtype=jnp.float32)) + 0.5
    rl = rm + 0.3 * jax.random.normal(k3, rshape, dtype=jnp.float32)
    for dist in ('gaussian', 'laplacian'):
        loss = jax.block_until_ready(
            parametric_depth_nll_loss(rm, rs, rl, dist=dist))
        ref = _reference(rm, rs, rl, dist=dist)
        assert jnp.allclose(loss, ref, rtol=1e-5, atol=1e-5), (dist, loss, ref)
        nll_map = jax.block_until_ready(
            parametric_depth_nll_loss(rm, rs, rl, dist=dist, reduction='none'))
        ref_map = _reference(rm, rs, rl, dist=dist, reduction='none')
        assert jnp.allclose(nll_map, ref_map, rtol=1e-5, atol=1e-5), dist

    print("KERNEL_OK")
</pallas_src>

<mosaic_0001>
module attributes {stable_mosaic.version = 11 : i64} {
  func.func @_nll_sum_kernel(%arg0: i32, %arg1: i32, %arg2: memref<16x128xf32, #tpu.memory_space<vmem>>, %arg3: memref<16x128xf32, #tpu.memory_space<vmem>>, %arg4: memref<16x128xf32, #tpu.memory_space<vmem>>, %arg5: memref<1x1xf32, #tpu.memory_space<smem>>, %arg6: memref<16x128xf32, #tpu.memory_space<vmem>>) attributes {dimension_semantics = [#tpu.dimension_semantics<parallel>, #tpu.dimension_semantics<arbitrary>], iteration_bounds = array<i64: 1, 1>, scalar_prefetch = 0 : i64, scratch_operands = 1 : i64, tpu.core_type = #tpu.core_type<tc>, window_params = [{transform_indices = @transform_0, window_bounds = array<i64: 16, 128>}, {transform_indices = @transform_1, window_bounds = array<i64: 16, 128>}, {transform_indices = @transform_2, window_bounds = array<i64: 16, 128>}, {transform_indices = @transform_3, window_bounds = array<i64: 1, 1>}]} {
    %c0_i32 = arith.constant 0 : i32
    %0 = arith.cmpi eq, %arg1, %c0_i32 : i32
    %1 = arith.extui %0 : i1 to i32
    %c0_i32_0 = arith.constant 0 : i32
    %2 = arith.cmpi ne, %1, %c0_i32_0 : i32
    scf.if %2 {
      %cst_12 = arith.constant 0.000000e+00 : f32
      %19 = vector.broadcast %cst_12 : f32 to vector<16x128xf32>
      %c0_13 = arith.constant 0 : index
      %c0_14 = arith.constant 0 : index
      %20 = vector.load %arg6[%c0_13, %c0_14] : memref<16x128xf32, #tpu.memory_space<vmem>>, vector<16x128xf32>
      tpu.vector_store %arg6[%c0_13, %c0_14], %19 {strides = array<i32>} : memref<16x128xf32, #tpu.memory_space<vmem>>, vector<16x128xf32>,
    } else {
    }
    %c0 = arith.constant 0 : index
    %c0_1 = arith.constant 0 : index
    %3 = vector.load %arg2[%c0, %c0_1] : memref<16x128xf32, #tpu.memory_space<vmem>>, vector<16x128xf32>
    %c0_2 = arith.constant 0 : index
    %c0_3 = arith.constant 0 : index
    %4 = vector.load %arg3[%c0_2, %c0_3] : memref<16x128xf32, #tpu.memory_space<vmem>>, vector<16x128xf32>
    %c0_4 = arith.constant 0 : index
    %c0_5 = arith.constant 0 : index
    %5 = vector.load %arg4[%c0_4, %c0_5] : memref<16x128xf32, #tpu.memory_space<vmem>>, vector<16x128xf32>
    %6 = arith.subf %3, %5 : vector<16x128xf32>
    %7 = arith.divf %6, %4 : vector<16x128xf32>
    %cst = arith.constant 5.000000e-01 : f32
    %8 = vector.broadcast %cst : f32 to vector<16x128xf32>
    %9 = arith.mulf %8, %7 : vector<16x128xf32>
    %10 = arith.mulf %9, %7 : vector<16x128xf32>
    %11 = math.log %4 : vector<16x128xf32>
    %12 = arith.addf %10, %11 : vector<16x128xf32>
    %c0_6 = arith.constant 0 : index
    %c0_7 = arith.constant 0 : index
    %13 = vector.load %arg6[%c0_6, %c0_7] : memref<16x128xf32, #tpu.memory_space<vmem>>, vector<16x128xf32>
    %14 = arith.addf %13, %12 : vector<16x128xf32>
    %c0_8 = arith.constant 0 : index
    %c0_9 = arith.constant 0 : index
    %15 = vector.load %arg6[%c0_8, %c0_9] : memref<16x128xf32, #tpu.memory_space<vmem>>, vector<16x128xf32>
    tpu.vector_store %arg6[%c0_8, %c0_9], %14 {strides = array<i32>} : memref<16x128xf32, #tpu.memory_space<vmem>>, vector<16x128xf32>,
    %c0_i32_10 = arith.constant 0 : i32
    %16 = arith.cmpi eq, %arg1, %c0_i32_10 : i32
    %17 = arith.extui %16 : i1 to i32
    %c0_i32_11 = arith.constant 0 : i32
    %18 = arith.cmpi ne, %17, %c0_i32_11 : i32
    scf.if %18 {
      %c0_12 = arith.constant 0 : index
      %c0_13 = arith.constant 0 : index
      %19 = vector.load %arg6[%c0_12, %c0_13] : memref<16x128xf32, #tpu.memory_space<vmem>>, vector<16x128xf32>
      %20 = vector.shape_cast %19 : vector<16x128xf32> to vector<1x16x128xf32>
      %cst_14 = arith.constant dense<0.000000e+00> : vector<1xf32>
      %21 = vector.multi_reduction <add>, %20, %cst_14 [1, 2] : vector<1x16x128xf32> to vector<1xf32>
      %22 = vector.shape_cast %21 : vector<1xf32> to vector<1x1x1xf32>
      %23 = vector.extract %22[0, 0, 0] : f32 from vector<1x1x1xf32>
      %c0_15 = arith.constant 0 : index
      %c0_16 = arith.constant 0 : index
      %24 = memref.load %arg5[%c0_15, %c0_16] : memref<1x1xf32, #tpu.memory_space<smem>>
      memref.store %23, %arg5[%c0_15, %c0_16] : memref<1x1xf32, #tpu.memory_space<smem>>
    } else {
    }
    return
  }
  func.func @transform_0(%arg0: i32, %arg1: i32) -> (i32, i32) {
    %c1_i32 = arith.constant 1 : i32
    %0 = arith.muli %arg0, %c1_i32 : i32
    %1 = arith.addi %0, %arg1 : i32
    %c0_i32 = arith.constant 0 : i32
    %2 = arith.minsi %1, %c0_i32 : i32
    %c0_i32_0 = arith.constant 0 : i32
    %c0_i32_1 = arith.constant 0 : i32
    return %2, %c0_i32_0 : i32, i32
  }
  func.func @transform_1(%arg0: i32, %arg1: i32) -> (i32, i32) {
    %c1_i32 = arith.constant 1 : i32
    %0 = arith.muli %arg0, %c1_i32 : i32
    %1 = arith.addi %0, %arg1 : i32
    %c0_i32 = arith.constant 0 : i32
    %2 = arith.minsi %1, %c0_i32 : i32
    %c0_i32_0 = arith.constant 0 : i32
    %c0_i32_1 = arith.constant 0 : i32
    return %2, %c0_i32_0 : i32, i32
  }
  func.func @transform_2(%arg0: i32, %arg1: i32) -> (i32, i32) {
    %c1_i32 = arith.constant 1 : i32
    %0 = arith.muli %arg0, %c1_i32 : i32
    %1 = arith.addi %0, %arg1 : i32
    %c0_i32 = arith.constant 0 : i32
    %2 = arith.minsi %1, %c0_i32 : i32
    %c0_i32_0 = arith.constant 0 : i32
    %c0_i32_1 = arith.constant 0 : i32
    return %2, %c0_i32_0 : i32, i32
  }
  func.func @transform_3(%arg0: i32, %arg1: i32) -> (i32, i32) {
    %c0_i32 = arith.constant 0 : i32
    %c0_i32_0 = arith.constant 0 : i32
    return %arg0, %c0_i32 : i32, i32
  }
}

</mosaic_0001>

<bundles_post_ra>
// kernel: tpu_custom_call.1
= control target key start
LH: loop header
LB: loop body
LE: loop exit
PB: predicated region body
PF: predicated region fallthrough
CT: control target
= control target key end

     0   :  { %8 = vsyncpa [#allocation4], 0  ;;  %s338_s0 = inlined_call_operand.hbm [shape: f32[16,128], index: 0, kind: input, shape index: {}]   ;;  %s339_s1 = inlined_call_operand.hbm [shape: f32[16,128], index: 1, kind: input, shape index: {}]   ;;  %s340_s2 = inlined_call_operand.hbm [shape: f32[16,128], index: 2, kind: input, shape index: {}]   ;;  %s341_s3 = inlined_call_operand.hbm [shape: f32[1,1], index: 3, kind: output, shape index: {}]  }
   0x1   :  { %9 = vsyncpa [#allocation7], 0 }
   0x2   :  { %10 = vsyncpa [#allocation5], 0  ;;  %s40_s14 = sshll.u32 %s339_s1, 4  ;;  %s298_s15 = smov [#allocation6]   ;;  %s41_s14 = int_to_ptr.hbm [resolvable:$true] %s40_s14 }
   0x3   :  { %s42_s16 = sshll.u32 %s298_s15, 4  ;;  %s21_s19 = sshll.u32 %s338_s0, 4  ;;  %s43_s16 = int_to_ptr.vmem [resolvable:$true] %s42_s16  ;;  %s22_s19 = int_to_ptr.hbm [resolvable:$true] %s21_s19 }
   0x4   :  { %s299_s20 = smov 128   ;;  %s300_s21 = smov 8  }
   0x5   :  { %48 = dma.hbm_to_vmem [thread:$0]  %s41_s14, 256, %s43_s16, [#allocation7], %s299_s20, %s299_s20, %s300_s21  }
   0x6   :  { %s301_s22 = smov [#allocation3]   ;;  %s59_s26 = sshll.u32 %s340_s2, 4  ;;  %s60_s26 = int_to_ptr.hbm [resolvable:$true] %s59_s26 }
   0x7   :  { %s23_s23 = sshll.u32 %s301_s22, 4  ;;  %s302_s1 = smov [#allocation8]   ;;  %s24_s23 = int_to_ptr.vmem [resolvable:$true] %s23_s23 }
   0x8   :  { %29 = dma.hbm_to_vmem [thread:$0]  %s22_s19, 256, %s24_s23, [#allocation4], %s299_s20, %s299_s20, %s300_s21  }
   0x9   :  { %s61_s27 = sshll.u32 %s302_s1, 4  ;;  %s62_s27 = int_to_ptr.vmem [resolvable:$true] %s61_s27 }
   0xa   :  { %67 = dma.hbm_to_vmem [thread:$0]  %s60_s26, 256, %s62_s27, [#allocation7], %s299_s20, %s299_s20, %s300_s21  }
   0xb   :  { %292 = dma.done.wait [#allocation4], 256  }
   0xc   :  { %293 = vsyncadd [#allocation4], 4294967040 }
   0xd   :  { %294 = dma.done.wait [#allocation7], 512  }
   0xe   :  { %295 = vsyncadd [#allocation7], 4294966784  ;;  %v100_v0 = vld [vmem:[#allocation6] sm:$0xff]  ;;  %v101_v1 = vld [vmem:[#allocation6 + $0x8] sm:$0xff]  ;;  %s174_s28 = sshll.u32 %s341_s3, 4  ;;  %s303_s30 = smov [#allocation9]   ;;  %s175_s28 = int_to_ptr.hbm [resolvable:$true] %s174_s28 }
   0xf   :  { %200 = vrcp.f32 %v100_v0  ;;  %vm111_vm0 = vweird.f32 %v100_v0  ;;  %v115_v5 = vand.u32 2147483647, %v100_v0  ;;  %v117_v6 = vand.u32 2147483648, %v100_v0  ;;  %v98_v10 = vld [vmem:[#allocation3] sm:$0xff]  ;;  %v99_v14 = vld [vmem:[#allocation3 + $0x8] sm:$0xff] }
  0x10   :  { %202 = vrcp.f32 %v101_v1  ;;  %vm126_vm2 = vweird.f32 %v101_v1  ;;  %v132_v9 = vand.u32 2147483648, %v101_v1  ;;  %v102_v11 = vld [vmem:[#allocation8] sm:$0xff]  ;;  %v130_v13 = vand.u32 2147483647, %v101_v1  ;;  %v103_v15 = vld [vmem:[#allocation8 + $0x8] sm:$0xff] }
  0x11   :  { %204 = vlog2.f32 %v100_v0  ;;  %v118_v17 = vor.u32 1.1754944e-38, %v117_v6  ;;  %v104_v19 = vsub.f32 %v98_v10, %v102_v11  ;;  %vm116_vm5 = vcmp.eq.f32.partialorder %v115_v5, 8.507059e+37 }
  0x12   :  { %206 = vlog2.f32 %v101_v1  ;;  %v133_v21 = vor.u32 1.1754944e-38, %v132_v9  ;;  %v105_v22 = vsub.f32 %v99_v14, %v103_v15  ;;  %vm131_vm7 = vcmp.eq.f32.partialorder %v130_v13, 8.507059e+37 }
  0x15   :  { %v201_v2 = vpop.eup %200 }
  0x16   :  { %v203_v3 = vpop.eup %202  ;;  %v107_v4 = vmul.f32 %v201_v2, %v100_v0  ;;  %vm112_vm1 = vweird.f32 %v201_v2 }
  0x17   :  { %v122_v7 = vmul.f32 %v203_v3, %v101_v1  ;;  %vm127_vm3 = vweird.f32 %v203_v3  ;;  %vm113_vm4 = vmor %vm111_vm0, %vm112_vm1  ;;  %v205_v25 = vpop.eup %204 }
  0x18   :  { %v108_v8 = vsub.f32 1.0, %v107_v4  ;;  %vm128_vm6 = vmor %vm126_vm2, %vm127_vm3  ;;  %v207_v28 = vpop.eup %206  ;;  %v141_v33 = vmul.f32 0.6931472, %v205_v25 }
  0x19   :  { %v123_v12 = vsub.f32 1.0, %v122_v7  ;;  %v143_v35 = vmul.f32 0.6931472, %v207_v28 }
  0x1a   :  { %v109_v16 = vmul.f32 %v201_v2, %v108_v8 }
  0x1b   :  { %v124_v18 = vmul.f32 %v203_v3, %v123_v12 }
  0x1c   :  { %v110_v20 = vadd.f32 %v201_v2, %v109_v16 }
  0x1d   :  { %v125_v23 = vadd.f32 %v203_v3, %v124_v18 }
  0x1e   :  { %v114_v24 = vsel %vm113_vm4, %v201_v2, %v110_v20 }
  0x1f   :  { %v119_v26 = vsel %vm116_vm5, %v118_v17, %v114_v24  ;;  %v129_v27 = vsel %vm128_vm6, %v203_v3, %v125_v23 }
  0x20   :  { %v120_v29 = vmul.f32 %v119_v26, %v104_v19  ;;  %v134_v30 = vsel %vm131_vm7, %v133_v21, %v129_v27 }
  0x21   :  { %v135_v31 = vmul.f32 %v134_v30, %v105_v22 }
  0x22   :  { %v136_v32 = vmul.f32 0.5, %v120_v29 }
  0x23   :  { %v137_v34 = vmul.f32 0.5, %v135_v31 }
  0x24   :  { %v138_v36 = vmul.f32 %v136_v32, %v120_v29 }
  0x25   :  { %v139_v37 = vmul.f32 %v137_v34, %v135_v31 }
  0x26   :  { %v144_v38 = vadd.f32 %v141_v33, %v138_v36 }
  0x27   :  { %v145_v39 = vadd.f32 %v143_v35, %v139_v37 }
  0x29   :  { %v157_v40 = vadd.f32 %v145_v39, %v144_v38 }
  0x2b   :  { %158 = vadd.xlane.f32.xlu0 %v157_v40 }
  0x9e   :  { %v159_v41 = vpop.xlane.xlu0 %158 }
  0x9f   :  { %v160_v42 = vrot.slane %v159_v41, 4 }
  0xa1   :  { %v161_v43 = vadd.f32 %v160_v42, %v159_v41 }
  0xa3   :  { %v162_v44 = vrot.slane %v161_v43, 2 }
  0xa5   :  { %v163_v45 = vadd.f32 %v162_v44, %v161_v43 }
  0xa7   :  { %v164_v46 = vrot.slane %v163_v45, 1 }
  0xa9   :  { %v165_v47 = vadd.f32 %v164_v46, %v163_v45 }
  0xab   :  { %192 = vpush %v165_v47 }
  0xdc   :  { %s193_s29 = spop %192 }
  0xdd   :  { %168 = sst [smem:[#allocation9]] %s193_s29 }
  0xde   :  { %177 = dma.smem_to_hbm %s303_s30, 16, %s175_s28, [#allocation5]  }
  0xdf   :  { %296 = dma.done.wait [#allocation5], 16  }
  0xe0   :  { %297 = vsyncadd [#allocation5], 4294967280 }
  0xe1   :  { %182 = sfence }
  0xe2   :  { %183 = vsyncpa [#allocation4], 1 }
  0xe3   :  { %184 = vsyncpa [#allocation7], 1 }
  0xe4   :  { %185 = vsyncpa [#allocation5], 1 }

</bundles_post_ra>
